<compile_context>
chip_gen: v7x
topology: tpu7x:2x2x1
jax: 0.10.0
libtpu: 0.0.40
codegen_flags: <defaults>
</compile_context>

<pallas_src>
import functools

import jax
import jax.numpy as jnp
from jax import lax
from jax.experimental import pallas as pl
from jax.experimental.pallas import tpu as pltpu

_LANE = 128     # last dim padded to a multiple of this
_SUBLANE = 8    # f32 batch tiles are multiples of this (16 for bf16 inputs)


def _round_up(x, m):
    return ((x + m - 1) // m) * m


def pad_params(w_t, b, *, use_bf16_matmul=False):
    """Pad W^T / b to lane-dense (Hp, Hp) / (1, Hp) ONCE at parameter init.

    Zero padding is exact for this dynamics: tanh(0) = 0 and zero weight
    rows/columns contribute nothing, so padded lanes never contaminate real
    lanes.  bf16 applies only to the matmul operand W; the bias stays f32.
    """
    H = w_t.shape[0]
    Hp = _round_up(H, _LANE)
    w_p = jnp.pad(w_t, ((0, Hp - H), (0, Hp - H)))
    b_p = jnp.pad(b, (0, Hp - H)).reshape(1, Hp)
    if use_bf16_matmul:
        w_p = w_p.astype(jnp.bfloat16)
    return w_p, b_p


def _batch_tiling(B, *, bf16, block_m):
    """Batch tile size / padded batch: tile <= 128 rows, sublane aligned,
    and >= 2 tiles when the batch allows (megacore sharding on v7x)."""
    sub = 16 if bf16 else _SUBLANE          # bf16 packs two rows per sublane
    Bp = _round_up(B, sub)
    tm = min(block_m, 128, Bp)
    if Bp // tm < 2 and Bp >= 2 * sub:      # give the second TensorCore work
        tm = _round_up(-(-Bp // 2), sub)
    Bp = _round_up(Bp, tm)
    return Bp, tm


def _vmem_limit_bytes(tm, Hp, w_itemsize, x_itemsize):
    need = (Hp * Hp * w_itemsize            # W, single-buffered
            + _SUBLANE * Hp * 4             # bias row (sublane padded)
            + 2 * tm * Hp * x_itemsize      # x tile, double-buffered
            + 2 * tm * Hp * 4               # out tile, double-buffered
            + (4 << 20))                    # headroom for compiler scratch
    return max(min(need, 128 << 20), 32 << 20)


# ---------------------------------------------------------------------------
# Kernel 1: single dynamics evaluation  f(t, x) = tanh(x @ W^T + b)
#   x_ref: (tm, Hp)   w_ref: (Hp, Hp)   b_ref: (1, Hp)   o_ref: (tm, Hp)
# ---------------------------------------------------------------------------
def _dynamics_kernel(x_ref, w_ref, b_ref, o_ref):
    acc = jnp.dot(x_ref[...], w_ref[...], preferred_element_type=jnp.float32)
    o_ref[...] = jnp.tanh(acc + b_ref[...]).astype(o_ref.dtype)  # (1,Hp) bcast


def abstract_ode_net_forward(t, x, w_p, b_p, *, block_m=128):
    """f(t, x) = tanh(x @ W^T + b); t is unused (matches forward(self, t, x)).

    x: (B, H) f32.  w_p / b_p: pre-padded parameters from pad_params().
    """
    del t
    B, H = x.shape
    Hp = w_p.shape[-1]
    bf16 = w_p.dtype == jnp.bfloat16
    Bp, tm = _batch_tiling(B, bf16=bf16, block_m=block_m)

    x_p = jnp.pad(x, ((0, Bp - B), (0, Hp - H)))
    if bf16:
        x_p = x_p.astype(jnp.bfloat16)

    out = pl.pallas_call(
        _dynamics_kernel,
        out_shape=jax.ShapeDtypeStruct((Bp, Hp), x.dtype),
        grid=(Bp // tm,),
        in_specs=[
            pl.BlockSpec((tm, Hp), lambda i: (i, 0)),
            pl.BlockSpec((Hp, Hp), lambda i: (0, 0),     # resident, 1 buffer
                         pipeline_mode=pl.Buffered(1)),
            pl.BlockSpec((1, Hp), lambda i: (0, 0),
                         pipeline_mode=pl.Buffered(1)),
        ],
        out_specs=pl.BlockSpec((tm, Hp), lambda i: (i, 0)),
        compiler_params=pltpu.CompilerParams(
            dimension_semantics=("parallel",),
            vmem_limit_bytes=_vmem_limit_bytes(
                tm, Hp, w_p.dtype.itemsize, x_p.dtype.itemsize),
        ),
        cost_estimate=pl.CostEstimate(
            flops=2 * Bp * Hp * Hp,
            transcendentals=Bp * Hp,
            bytes_accessed=(2 * Bp * Hp * 4
                            + Hp * Hp * w_p.dtype.itemsize + Hp * 4),
        ),
    )(x_p, w_p, b_p)
    return out[:B, :H]


# ---------------------------------------------------------------------------
# Kernel 2: fused fixed-step Euler rollout of the dynamics inside ONE call
#   x_{s+1} = x_s + dt * tanh(x_s @ W^T + b),  s = 0..n_steps-1
# State lives directly in the resident f32 output block; W/b are loaded once
# per batch tile and stay in VMEM for all steps.
# ---------------------------------------------------------------------------
def _euler_rollout_kernel(n_steps, dt, matmul_dtype,
                          x_ref, w_ref, b_ref, o_ref):
    o_ref[...] = x_ref[...].astype(jnp.float32)
    w = w_ref[...]                 # (Hp, Hp), loaded once per batch tile
    b_row = b_ref[...]             # (1, Hp); broadcasts in the add

    def step(_, carry):
        x = o_ref[...]
        acc = jnp.dot(x.astype(matmul_dtype), w,
                      preferred_element_type=jnp.float32) + b_row
        # bf16 tanh rides the EUP fast path on v6e/v7x; f32 path is a no-op.
        dx = jnp.tanh(acc.astype(matmul_dtype)).astype(jnp.float32)
        o_ref[...] = x + dt * dx                      # Euler update in f32
        return carry

    # Serially dependent, latency-bound loop: unroll for LLO visibility.
    unroll = True if n_steps <= 32 else 4
    lax.fori_loop(0, n_steps, step, 0, unroll=unroll)


def ode_net_euler_rollout(x0, w_p, b_p, *, dt, n_steps, block_m=128):
    """Integrate dx/dt = tanh(x @ W^T + b) with n_steps explicit-Euler steps,
    fused into a single pallas_call."""
    B, H = x0.shape
    Hp = w_p.shape[-1]
    bf16 = w_p.dtype == jnp.bfloat16
    Bp, tm = _batch_tiling(B, bf16=bf16, block_m=block_m)

    x_p = jnp.pad(x0, ((0, Bp - B), (0, Hp - H)))     # state stays f32

    matmul_dtype = jnp.bfloat16 if bf16 else jnp.float32
    kernel = functools.partial(
        _euler_rollout_kernel, int(n_steps), float(dt), matmul_dtype)

    out = pl.pallas_call(
        kernel,
        out_shape=jax.ShapeDtypeStruct((Bp, Hp), jnp.float32),
        grid=(Bp // tm,),
        in_specs=[
            pl.BlockSpec((tm, Hp), lambda i: (i, 0)),
            pl.BlockSpec((Hp, Hp), lambda i: (0, 0),     # W resident
                         pipeline_mode=pl.Buffered(1)),
            pl.BlockSpec((1, Hp), lambda i: (0, 0),      # b resident
                         pipeline_mode=pl.Buffered(1)),
        ],
        out_specs=pl.BlockSpec((tm, Hp), lambda i: (i, 0)),
        compiler_params=pltpu.CompilerParams(
            dimension_semantics=("parallel",),
            vmem_limit_bytes=_vmem_limit_bytes(
                tm, Hp, w_p.dtype.itemsize, 4),
        ),
        cost_estimate=pl.CostEstimate(
            flops=2 * n_steps * Bp * Hp * Hp,
            transcendentals=n_steps * Bp * Hp,
            bytes_accessed=(2 * Bp * Hp * 4
                            + Hp * Hp * w_p.dtype.itemsize + Hp * 4),
        ),
    )(x_p, w_p, b_p)
    return out[:B, :H].astype(x0.dtype)


# ---------------------------------------------------------------------------
# Pure-JAX references
# ---------------------------------------------------------------------------
def reference_forward(t, x, w_t, b):
    del t
    return jnp.tanh(x @ w_t + b)


def reference_euler(x, w_t, b, dt, n_steps):
    for _ in range(n_steps):
        x = x + dt * jnp.tanh(x @ w_t + b)
    return x


if __name__ == "__main__":
    hidden_layer_size = 32
    batch = 8

    key = jax.random.PRNGKey(0)
    k_x, k_w, k_b = jax.random.split(key, 3)

    # nn.Linear(hidden, hidden): PyTorch weight is (out, in); keep W^T layout.
    w = jax.random.normal(k_w, (hidden_layer_size, hidden_layer_size),
                          dtype=jnp.float32) * 0.1
    w_t = w.T
    b = jax.random.normal(k_b, (hidden_layer_size,), dtype=jnp.float32) * 0.1
    x = jax.random.normal(k_x, (batch, hidden_layer_size), dtype=jnp.float32)
    t = jnp.float32(0.0)  # unused, mirrors forward(self, t, x)

    # Parameter padding / bf16 cast happens ONCE (hoisted out of the wrappers).
    w_p, b_p = pad_params(w_t, b)
    w_p_bf16, b_p_bf16 = pad_params(w_t, b, use_bf16_matmul=True)

    # 1) Single dynamics evaluation f(t, x) — exact module semantics.
    out = jax.block_until_ready(abstract_ode_net_forward(t, x, w_p, b_p))
    ref = reference_forward(t, x, w_t, b)
    assert out.shape == (batch, hidden_layer_size)
    assert jnp.allclose(out, ref, atol=1e-4, rtol=1e-4)

    # 2) Fused multi-step Euler rollout (how ODE-RNN subclasses drive f).
    n_steps, dt = 16, 0.05
    xt = jax.block_until_ready(
        ode_net_euler_rollout(x, w_p, b_p, dt=dt, n_steps=n_steps))
    ref_t = reference_euler(x, w_t, b, dt, n_steps)
    assert xt.shape == (batch, hidden_layer_size)
    assert jnp.allclose(xt, ref_t, atol=1e-3, rtol=1e-3)

    # 3) bf16-matmul fast path (valid on v5e/v6e/v7x; f32 accumulate).
    out_bf16 = jax.block_until_ready(
        abstract_ode_net_forward(t, x, w_p_bf16, b_p_bf16))
    assert jnp.allclose(out_bf16, ref, atol=3e-2, rtol=3e-2)

    # 4) bf16 rollout; tolerance scaled with n_steps*dt error compounding.
    xt_bf16 = jax.block_until_ready(
        ode_net_euler_rollout(x, w_p_bf16, b_p_bf16, dt=dt, n_steps=n_steps))
    tol = 3e-2 * (1.0 + n_steps * dt)
    assert jnp.allclose(xt_bf16, ref_t, atol=tol, rtol=tol)

    # TODO(synk): remap()/use_cb()/observe() are codebook/observer bookkeeping
    # with no forward-pass compute; not kernelized.

    print("KERNEL_OK")
</pallas_src>

<mosaic_0001>
module attributes {stable_mosaic.version = 11 : i64} {
  func.func @_dynamics_kernel(%arg0: i32, %arg1: memref<8x128xf32, #tpu.memory_space<vmem>>, %arg2: memref<128x128xf32, #tpu.memory_space<vmem>>, %arg3: memref<1x128xf32, #tpu.memory_space<vmem>>, %arg4: memref<8x128xf32, #tpu.memory_space<vmem>>) attributes {dimension_semantics = [#tpu.dimension_semantics<parallel>], iteration_bounds = array<i64: 1>, scalar_prefetch = 0 : i64, scratch_operands = 0 : i64, tpu.core_type = #tpu.core_type<tc>, window_params = [{transform_indices = @transform_0, window_bounds = array<i64: 8, 128>}, {pipeline_mode = #tpu.pipeline_mode<synchronous>, transform_indices = @transform_1, window_bounds = array<i64: 128, 128>}, {pipeline_mode = #tpu.pipeline_mode<synchronous>, transform_indices = @transform_2, window_bounds = array<i64: 1, 128>}, {transform_indices = @transform_3, window_bounds = array<i64: 8, 128>}]} {
    %c0 = arith.constant 0 : index
    %c0_0 = arith.constant 0 : index
    %0 = vector.load %arg1[%c0, %c0_0] : memref<8x128xf32, #tpu.memory_space<vmem>>, vector<8x128xf32>
    %c0_1 = arith.constant 0 : index
    %c0_2 = arith.constant 0 : index
    %1 = vector.load %arg2[%c0_1, %c0_2] : memref<128x128xf32, #tpu.memory_space<vmem>>, vector<128x128xf32>
    %cst = arith.constant dense<0.000000e+00> : vector<8x128xf32>
    %2 = tpu.matmul %0, %1, %cst {dimension_numbers = #tpu.dot_dimension_numbers<[1], [0], [0], [1], [0, 0, 1, 1], [], []>} : vector<8x128xf32>, vector<128x128xf32>, vector<8x128xf32> -> vector<8x128xf32>
    %c0_3 = arith.constant 0 : index
    %c0_4 = arith.constant 0 : index
    %3 = vector.load %arg3[%c0_3, %c0_4] : memref<1x128xf32, #tpu.memory_space<vmem>>, vector<1x128xf32>
    %4 = vector.broadcast %3 : vector<1x128xf32> to vector<8x128xf32>
    %5 = arith.addf %2, %4 : vector<8x128xf32>
    %6 = math.tanh %5 : vector<8x128xf32>
    %c0_5 = arith.constant 0 : index
    %c0_6 = arith.constant 0 : index
    %7 = vector.load %arg4[%c0_5, %c0_6] : memref<8x128xf32, #tpu.memory_space<vmem>>, vector<8x128xf32>
    tpu.vector_store %arg4[%c0_5, %c0_6], %6 {strides = array<i32>} : memref<8x128xf32, #tpu.memory_space<vmem>>, vector<8x128xf32>,
    return
  }
  func.func @transform_0(%arg0: i32) -> (i32, i32) {
    %c0_i32 = arith.constant 0 : i32
    %c0_i32_0 = arith.constant 0 : i32
    return %arg0, %c0_i32 : i32, i32
  }
  func.func @transform_1(%arg0: i32) -> (i32, i32) {
    %c0_i32 = arith.constant 0 : i32
    %c0_i32_0 = arith.constant 0 : i32
    %c0_i32_1 = arith.constant 0 : i32
    return %c0_i32, %c0_i32_0 : i32, i32
  }
  func.func @transform_2(%arg0: i32) -> (i32, i32) {
    %c0_i32 = arith.constant 0 : i32
    %c0_i32_0 = arith.constant 0 : i32
    %c0_i32_1 = arith.constant 0 : i32
    return %c0_i32, %c0_i32_0 : i32, i32
  }
  func.func @transform_3(%arg0: i32) -> (i32, i32) {
    %c0_i32 = arith.constant 0 : i32
    %c0_i32_0 = arith.constant 0 : i32
    return %arg0, %c0_i32 : i32, i32
  }
}

</mosaic_0001>

<bundles_post_ra>
// kernel: tpu_custom_call.1
= control target key start
LH: loop header
LB: loop body
LE: loop exit
PB: predicated region body
PF: predicated region fallthrough
CT: control target
= control target key end

     0   :  { %8 = vsyncpa [#allocation3], 0  ;;  %s386_s0 = inlined_call_operand.hbm [shape: f32[8,128], index: 0, kind: input, shape index: {}]   ;;  %s387_s1 = inlined_call_operand.hbm [shape: f32[128,128], index: 1, kind: input, shape index: {}]   ;;  %s388_s2 = inlined_call_operand.vmem [shape: f32[1,128], index: 2, kind: input, shape index: {}]   ;;  %s389_s3 = inlined_call_operand.hbm [shape: f32[8,128], index: 3, kind: output, shape index: {}]  }
   0x1   :  { %9 = vsyncpa [#allocation6], 0 }
   0x2   :  { %10 = vsyncpa [#allocation4], 0  ;;  %s312_s12 = smov [#allocation2]   ;;  %s313_s14 = smov [#allocation5]  }
   0x3   :  { %s17_s13 = sshll.u32 %s312_s12, 4  ;;  %s26_s15 = sshll.u32 %s313_s14, 4  ;;  %s18_s13 = int_to_ptr.vmem [resolvable:$true] %s17_s13  ;;  %s340_s15 = int_to_ptr.vmem [resolvable:$true] %s26_s15 }
   0x4   :  { %s240_s18 = scalar_lea.hbm %s386_s0, 128 }
   0x5   :  { %p241_p0 = scmp.ne.s32.totalorder %s386_s0, %s240_s18  ;;  %p244_p1 = scmp.lt.u32.totalorder %s240_s18, %s386_s0 }
   0x7   :  { %p246_p2 = pnand %p244_p1, %p241_p0 }
   0x9   :  { %249 = shalt.err (!%p246_p2)
}
   0xa   :  { %s250_s23 = scalar_lea.vmem %s18_s13, 128  ;;  %p255_p4 = scmp.lt.s32.totalorder %s18_s13, %s18_s13 }
   0xb   :  { %p251_p3 = scmp.ne.s32.totalorder %s18_s13, %s250_s23  ;;  %p256_p5 = scmp.lt.s32.totalorder %s250_s23, %s250_s23 }
   0xd   :  { %p257_p6 = por %p256_p5, %p255_p4 }
   0xf   :  { %p258_p7 = pnand %p257_p6, %p251_p3 }
  0x11   :  { %261 = shalt.err (!%p258_p7)
}
  0x12   :  { %20 = dma.hbm_to_vmem [thread:$0]  %s386_s0, 128, %s18_s13, [#allocation3]  }
  0x13   :  { %s262_s28 = scalar_lea.hbm %s387_s1, 2048 }
  0x14   :  { %p263_p8 = scmp.ne.s32.totalorder %s387_s1, %s262_s28  ;;  %p266_p9 = scmp.lt.u32.totalorder %s262_s28, %s387_s1 }
  0x16   :  { %p268_p10 = pnand %p266_p9, %p263_p8 }
  0x18   :  { %271 = shalt.err (!%p268_p10)
}
  0x19   :  { %s272_s6 = scalar_lea.vmem %s340_s15, 2048  ;;  %p277_p12 = scmp.lt.s32.totalorder %s340_s15, %s340_s15 }
  0x1a   :  { %p273_p11 = scmp.ne.s32.totalorder %s340_s15, %s272_s6  ;;  %p278_p13 = scmp.lt.s32.totalorder %s272_s6, %s272_s6 }
  0x1c   :  { %p279_p0 = por %p278_p13, %p277_p12 }
  0x1e   :  { %p280_p1 = pnand %p279_p0, %p273_p11 }
  0x20   :  { %283 = shalt.err (!%p280_p1)
}
  0x21   :  { %s314_s0 = smov 128   ;;  %s315_s7 = smov 8  }
  0x22   :  { %32 = dma.hbm_to_vmem [thread:$0]  %s387_s1, 2048, %s340_s15, [#allocation6], %s314_s0, %s314_s0, %s315_s7  }
  0x23   :  { %306 = dma.done.wait [#allocation3], 128  }
  0x24   :  { %307 = vsyncadd [#allocation3], 4294967168 }
  0x25   :  { %308 = dma.done.wait [#allocation6], 2048  }
  0x26   :  { %309 = vsyncadd [#allocation6], 4294965248  ;;  %v316_v0 = vmov 0.0|0.0   ;;  %vm317_vm0 = vmmov 0   ;;  %v318_v1 = vmov 0.0   ;;  %v42_v2 = vld [vmem:[#allocation5] sm:$0xff] }
  0x27   :  { %206 = vmatprep.subr.bf16.mxu0 %v316_v0  ;;  %203 = vmatprep.mubr.msk.f32.mxu0 %vm317_vm0, %v318_v1  ;;  %v43_v3 = vld [vmem:[#allocation5 + $0x8] sm:$0xff]  ;;  %v44_v4 = vld [vmem:[#allocation5 + $0x10] sm:$0xff]  ;;  %v45_v6 = vld [vmem:[#allocation5 + $0x18] sm:$0xff]  ;;  %s319_s11 = smov [#allocation7]  }
  0x28   :  { %v207_v5 = vpack.c.bf16 %v43_v3, %v42_v2  ;;  %v210_v7 = vpack.c.bf16 %v45_v6, %v44_v4  ;;  %v46_v8 = vld [vmem:[#allocation5 + $0x20] sm:$0xff]  ;;  %v47_v9 = vld [vmem:[#allocation5 + $0x28] sm:$0xff]  ;;  %v48_v11 = vld [vmem:[#allocation5 + $0x30] sm:$0xff]  ;;  %s143_s12 = sshll.u32 %s319_s11, 4  ;;  %s144_s12 = int_to_ptr.vmem [resolvable:$true] %s143_s12 }
  0x29   :  { %v213_v10 = vpack.c.bf16 %v47_v9, %v46_v8  ;;  %v49_v12 = vld [vmem:[#allocation5 + $0x38] sm:$0xff]  ;;  %v50_v14 = vld [vmem:[#allocation5 + $0x40] sm:$0xff]  ;;  %v51_v15 = vld [vmem:[#allocation5 + $0x48] sm:$0xff]  ;;  %s284_s13 = scalar_lea.vmem %s144_s12, 128  ;;  %p289_p3 = scmp.lt.s32.totalorder %s144_s12, %s144_s12 }
  0x2a   :  { %208 = vmatpush3.bf16.msra.mxu0 %v207_v5  ;;  %v216_v13 = vpack.c.bf16 %v49_v12, %v48_v11  ;;  %v219_v16 = vpack.c.bf16 %v51_v15, %v50_v14  ;;  %v52_v17 = vld [vmem:[#allocation5 + $0x50] sm:$0xff]  ;;  %v53_v18 = vld [vmem:[#allocation5 + $0x58] sm:$0xff]  ;;  %v54_v20 = vld [vmem:[#allocation5 + $0x60] sm:$0xff]  ;;  %p285_p2 = scmp.ne.s32.totalorder %s144_s12, %s284_s13  ;;  %p290_p4 = scmp.lt.s32.totalorder %s284_s13, %s284_s13 }
  0x2b   :  { %209 = vmatprep.subr.bf16.mxu0 %v316_v0  ;;  %v222_v19 = vpack.c.bf16 %v53_v18, %v52_v17  ;;  %v55_v21 = vld [vmem:[#allocation5 + $0x68] sm:$0xff]  ;;  %v56_v23 = vld [vmem:[#allocation5 + $0x70] sm:$0xff]  ;;  %v57_v24 = vld [vmem:[#allocation5 + $0x78] sm:$0xff] }
  0x2c   :  { %v225_v22 = vpack.c.bf16 %v55_v21, %v54_v20  ;;  %v228_v25 = vpack.c.bf16 %v57_v24, %v56_v23  ;;  %v41_v26 = vld [vmem:[#allocation2] sm:$0xff]  ;;  %p291_p5 = por %p290_p4, %p289_p3 }
  0x2d   :  { %v153_v27 = vld [vmem:[%s388_s2] ss:$0 sm:$0xff] }
  0x2e   :  { %211 = vmatpush3.bf16.msra.mxu0 %v210_v7  ;;  %p292_p6 = pnand %p291_p5, %p285_p2 }
  0x2f   :  { %212 = vmatprep.subr.bf16.mxu0 %v316_v0 }
  0x32   :  { %214 = vmatpush3.bf16.msra.mxu0 %v213_v10 }
  0x33   :  { %215 = vmatprep.subr.bf16.mxu0 %v316_v0 }
  0x36   :  { %217 = vmatpush3.bf16.msra.mxu0 %v216_v13 }
  0x37   :  { %218 = vmatprep.subr.bf16.mxu0 %v316_v0 }
  0x3a   :  { %220 = vmatpush3.bf16.msra.mxu0 %v219_v16 }
  0x3b   :  { %221 = vmatprep.subr.bf16.mxu0 %v316_v0 }
  0x3e   :  { %223 = vmatpush3.bf16.msra.mxu0 %v222_v19 }
  0x3f   :  { %224 = vmatprep.subr.bf16.mxu0 %v316_v0 }
  0x42   :  { %226 = vmatpush3.bf16.msra.mxu0 %v225_v22 }
  0x43   :  { %227 = vmatprep.subr.bf16.mxu0 %v316_v0 }
  0x46   :  { %229 = vmatpush3.bf16.msra.mxu0 %v228_v25 }
  0x49   :  { %204 = vmatmul.mubr.f32.vlgmr.msra.gmra.mrb[0].mxu0 %v41_v26 }
 0x11c   :  { %v131_v28 = vpop.f32.mrb[0].mxu0 }
 0x11d   :  { %v132_v29 = vadd.f32 %v153_v27, %v131_v28  ;;  %v205_v30 = vpop.f32.mrb[1].mxu0 }
 0x11f   :  { %238 = vtanh.f32 %v132_v29 }
 0x129   :  { %v239_v31 = vpop.eup %238 }
 0x12a   :  { %136 = vst [vmem:[#allocation7] sm:$0xff] %v239_v31 }
 0x12b   :  { %295 = shalt.err (!%p292_p6)
}
 0x12c   :  { %s296_s2 = scalar_lea.hbm %s389_s3, 128 }
 0x12d   :  { %p297_p7 = scmp.ne.s32.totalorder %s389_s3, %s296_s2  ;;  %p300_p8 = scmp.lt.u32.totalorder %s296_s2, %s389_s3 }
 0x12f   :  { %p302_p9 = pnand %p300_p8, %p297_p7 }
 0x131   :  { %305 = shalt.err (!%p302_p9)
}
 0x132   :  { %146 = dma.vmem_to_hbm [thread:$0]  %s144_s12, 128, %s389_s3, [#allocation4]  }
 0x133   :  { %310 = dma.done.wait [#allocation4], 128  }
 0x134   :  { %311 = vsyncadd [#allocation4], 4294967168 }
 0x135   :  { %150 = vsyncpa [#allocation3], 1 }
 0x136   :  { %151 = vsyncpa [#allocation6], 1 }
 0x137   :  { %152 = vsyncpa [#allocation4], 1 }

</bundles_post_ra>
